<compile_context>
chip_gen: v5e
topology: v5e:2x2
jax: 0.10.0
libtpu: 0.0.40
codegen_flags: <defaults>
</compile_context>

<pallas_src>
import jax
import jax.numpy as jnp
from jax.experimental import pallas as pl
from jax.experimental.pallas import tpu as pltpu

# Layer sizes fixed by the PyTorch module spec.
IN_F, H1_F, H2_F, OUT_F = 2, 4, 4, 2

LANES = 128
SUBLANES = 8
BATCH_ALIGN = LANES * SUBLANES  # 1024: each batch tile fills whole (8,128) vregs

# Offsets into the packed flat parameter vector (PyTorch (out, in) row-major).
_W1_OFF = 0
_B1_OFF = _W1_OFF + H1_F * IN_F       # 8
_W2_OFF = _B1_OFF + H1_F              # 12
_B2_OFF = _W2_OFF + H2_F * H1_F       # 28
_W3_OFF = _B2_OFF + H2_F              # 32
_B3_OFF = _W3_OFF + OUT_F * H2_F      # 40
_N_PARAMS = _B3_OFF + OUT_F           # 42


def _mlp_kernel(p_ref, x_ref, out_ref):
    # p_ref:   (42,) f32 in SMEM -- packed weights/biases, resident across steps.
    # x_ref:   (IN_F, R, 128) f32 VMEM block; batch lives on (sublane, lane).
    # out_ref: (OUT_F, R, 128) f32 VMEM block.
    x0 = x_ref[0]                                   # dense (R, 128) plane
    x1 = x_ref[1]

    # fc1 + relu1: unrolled VPU broadcast-FMAs with scalar weights from SMEM.
    h1 = []
    for j in range(H1_F):
        acc = (p_ref[_B1_OFF + j]
               + p_ref[_W1_OFF + j * IN_F + 0] * x0
               + p_ref[_W1_OFF + j * IN_F + 1] * x1)
        h1.append(jnp.maximum(acc, 0.0))

    # fc2 + relu2
    h2 = []
    for j in range(H2_F):
        acc = p_ref[_B2_OFF + j]
        for k in range(H1_F):
            acc = acc + p_ref[_W2_OFF + j * H1_F + k] * h1[k]
        h2.append(jnp.maximum(acc, 0.0))

    # fc3 (no activation): store each output row directly (no concat temp).
    for j in range(OUT_F):
        acc = p_ref[_B3_OFF + j]
        for k in range(H2_F):
            acc = acc + p_ref[_W3_OFF + j * H2_F + k] * h2[k]
        out_ref[j] = acc.astype(out_ref.dtype)


def _round_up(n, m):
    return ((n + m - 1) // m) * m


def _choose_tile(batch, tile_b):
    """Pick a 1024-aligned batch tile, preferring >=2 grid steps (v7x megacore)."""
    aligned = _round_up(batch, BATCH_ALIGN)
    tb = min(_round_up(tile_b, BATCH_ALIGN), aligned)
    if aligned // tb < 2 and aligned >= 2 * BATCH_ALIGN:
        tb = _round_up((aligned + 1) // 2, BATCH_ALIGN)
    b_pad = _round_up(batch, tb)
    return tb, b_pad


def _pack_params(params):
    return jnp.concatenate([
        params["w1"].reshape(-1), params["b1"].reshape(-1),
        params["w2"].reshape(-1), params["b2"].reshape(-1),
        params["w3"].reshape(-1), params["b3"].reshape(-1),
    ]).astype(jnp.float32)


def feedforward_pallas_fm(xt, params, *, tile_b=262144):
    """Feature-major path: xt is (2, B) f32, returns (2, B).

    No wrapper relayouts beyond zero-padding the batch axis up to a whole
    number of tiles; the (F, b_pad) <-> (F, b_pad//128, 128) reshapes are free
    row-major views.
    """
    assert xt.shape[0] == IN_F
    B = xt.shape[1]
    tb, b_pad = _choose_tile(B, tile_b)
    R = tb // LANES                                  # rows per tile (multiple of 8)

    xt_p = xt.astype(jnp.float32)
    if b_pad != B:
        xt_p = jnp.pad(xt_p, ((0, 0), (0, b_pad - B)))
    x3 = xt_p.reshape(IN_F, b_pad // LANES, LANES)   # batch -> (sublane-rows, lanes)

    # Double-buffered in+out tiles; keep the requested limit modest (safe on
    # v7x's 64 MiB physical VMEM) and above the v5e 16 MiB default when needed.
    vmem_needed = 2 * (IN_F + OUT_F) * tb * 4
    vmem_limit = min(max(vmem_needed + (4 << 20), 32 << 20), 48 << 20)

    out3 = pl.pallas_call(
        _mlp_kernel,
        out_shape=jax.ShapeDtypeStruct((OUT_F, b_pad // LANES, LANES), jnp.float32),
        grid=(b_pad // tb,),
        in_specs=[
            pl.BlockSpec(memory_space=pltpu.MemorySpace.SMEM),       # packed params (resident)
            pl.BlockSpec((IN_F, R, LANES), lambda i: (0, i, 0)),     # streamed x tile
        ],
        out_specs=pl.BlockSpec((OUT_F, R, LANES), lambda i: (0, i, 0)),
        compiler_params=pltpu.CompilerParams(
            dimension_semantics=("parallel",),                        # megacore split on v7x
            vmem_limit_bytes=vmem_limit,
        ),
    )(_pack_params(params), x3)

    return out3.reshape(OUT_F, b_pad)[:, :B]


def feedforward_pallas(x, params, *, tile_b=262144, allow_fallback=True,
                       min_kernel_batch=4096):
    """PyTorch-layout path: x is (B, 2), returns (B, 2).

    NOTE: x.T and out.T are extra full-array HBM passes around a mem-bound
    kernel; for large feature-major workloads use feedforward_pallas_fm().
    """
    B = x.shape[0]
    if allow_fallback and B < min_kernel_batch:
        # Tiny batches: XLA fuses three tiny matmuls; a kernel launch + pad +
        # transposes would be pure overhead.
        return feedforward_ref(x, params)
    out_t = feedforward_pallas_fm(x.astype(jnp.float32).T, params, tile_b=tile_b)
    return out_t.T


def init_params(key):
    """torch.nn.Linear-style init: W (out,in), b (out,), U[-1/sqrt(fan_in), 1/sqrt(fan_in)]."""
    sizes = [(IN_F, H1_F), (H1_F, H2_F), (H2_F, OUT_F)]
    params = {}
    for i, (fin, fout) in enumerate(sizes, start=1):
        key, kw, kb = jax.random.split(key, 3)
        bound = 1.0 / (fin ** 0.5)
        params[f"w{i}"] = jax.random.uniform(kw, (fout, fin), jnp.float32, -bound, bound)
        params[f"b{i}"] = jax.random.uniform(kb, (fout,), jnp.float32, -bound, bound)
    return params


def feedforward_ref(x, params):
    """Pure-JAX reference with PyTorch semantics: y = x @ W^T + b."""
    h1 = jnp.maximum(x @ params["w1"].T + params["b1"], 0.0)
    h2 = jnp.maximum(h1 @ params["w2"].T + params["b2"], 0.0)
    return h2 @ params["w3"].T + params["b3"]


if __name__ == "__main__":
    key = jax.random.PRNGKey(0)
    key, kx_small, kx_mid = jax.random.split(key, 3)
    params = init_params(key)

    # 1) Tiny batch, kernel forced (single grid step, one 1024-row tile).
    x_small = jax.random.normal(kx_small, (8, IN_F), jnp.float32)
    out_small = jax.block_until_ready(
        feedforward_pallas(x_small, params, allow_fallback=False))
    assert out_small.shape == (8, OUT_F)
    assert jnp.allclose(out_small, feedforward_ref(x_small, params), atol=1e-5, rtol=1e-5)

    # 2) Multi-step pipelined grid (small tile_b on purpose to exercise >=2 steps).
    x_mid = jax.random.normal(kx_mid, (6000, IN_F), jnp.float32)
    out_mid = jax.block_until_ready(
        feedforward_pallas(x_mid, params, tile_b=2048, allow_fallback=False))
    assert out_mid.shape == (6000, OUT_F)
    ref_mid = feedforward_ref(x_mid, params)
    assert jnp.allclose(out_mid, ref_mid, atol=1e-5, rtol=1e-5)

    # 3) Feature-major path (no wrapper transposes at all).
    out_fm = jax.block_until_ready(
        feedforward_pallas_fm(x_mid.T, params, tile_b=2048))
    assert out_fm.shape == (OUT_F, 6000)
    assert jnp.allclose(out_fm.T, ref_mid, atol=1e-5, rtol=1e-5)

    # 4) Small-batch fallback path (plain XLA, no kernel launch).
    out_fb = jax.block_until_ready(feedforward_pallas(x_small, params))
    assert jnp.allclose(out_fb, feedforward_ref(x_small, params), atol=1e-6)

    print("KERNEL_OK")
</pallas_src>

<mosaic_0001>
module attributes {stable_mosaic.version = 11 : i64} {
  func.func @_mlp_kernel(%arg0: i32, %arg1: memref<42xf32, #tpu.memory_space<smem>>, %arg2: memref<2x8x128xf32, #tpu.memory_space<vmem>>, %arg3: memref<2x8x128xf32, #tpu.memory_space<vmem>>) attributes {dimension_semantics = [#tpu.dimension_semantics<parallel>], iteration_bounds = array<i64: 1>, scalar_prefetch = 0 : i64, scratch_operands = 0 : i64, tpu.core_type = #tpu.core_type<tc>, window_params = [{transform_indices = @transform_0, window_bounds = array<i64: 42>}, {transform_indices = @transform_1, window_bounds = array<i64: 2, 8, 128>}, {transform_indices = @transform_2, window_bounds = array<i64: 2, 8, 128>}]} {
    %c0 = arith.constant 0 : index
    %c0_0 = arith.constant 0 : index
    %c0_1 = arith.constant 0 : index
    %0 = vector.load %arg2[%c0, %c0_0, %c0_1] : memref<2x8x128xf32, #tpu.memory_space<vmem>>, vector<1x8x128xf32>
    %1 = vector.shape_cast %0 : vector<1x8x128xf32> to vector<8x128xf32>
    %c1 = arith.constant 1 : index
    %c0_2 = arith.constant 0 : index
    %c0_3 = arith.constant 0 : index
    %2 = vector.load %arg2[%c1, %c0_2, %c0_3] : memref<2x8x128xf32, #tpu.memory_space<vmem>>, vector<1x8x128xf32>
    %3 = vector.shape_cast %2 : vector<1x8x128xf32> to vector<8x128xf32>
    %c8 = arith.constant 8 : index
    %4 = memref.load %arg1[%c8] : memref<42xf32, #tpu.memory_space<smem>>
    %c0_4 = arith.constant 0 : index
    %5 = memref.load %arg1[%c0_4] : memref<42xf32, #tpu.memory_space<smem>>
    %6 = vector.broadcast %5 : f32 to vector<8x128xf32>
    %7 = arith.mulf %6, %1 : vector<8x128xf32>
    %8 = vector.broadcast %4 : f32 to vector<8x128xf32>
    %9 = arith.addf %8, %7 : vector<8x128xf32>
    %c1_5 = arith.constant 1 : index
    %10 = memref.load %arg1[%c1_5] : memref<42xf32, #tpu.memory_space<smem>>
    %11 = vector.broadcast %10 : f32 to vector<8x128xf32>
    %12 = arith.mulf %11, %3 : vector<8x128xf32>
    %13 = arith.addf %9, %12 : vector<8x128xf32>
    %cst = arith.constant 0.000000e+00 : f32
    %14 = vector.broadcast %cst : f32 to vector<8x128xf32>
    %15 = arith.maximumf %13, %14 : vector<8x128xf32>
    %c9 = arith.constant 9 : index
    %16 = memref.load %arg1[%c9] : memref<42xf32, #tpu.memory_space<smem>>
    %c2 = arith.constant 2 : index
    %17 = memref.load %arg1[%c2] : memref<42xf32, #tpu.memory_space<smem>>
    %18 = vector.broadcast %17 : f32 to vector<8x128xf32>
    %19 = arith.mulf %18, %1 : vector<8x128xf32>
    %20 = vector.broadcast %16 : f32 to vector<8x128xf32>
    %21 = arith.addf %20, %19 : vector<8x128xf32>
    %c3 = arith.constant 3 : index
    %22 = memref.load %arg1[%c3] : memref<42xf32, #tpu.memory_space<smem>>
    %23 = vector.broadcast %22 : f32 to vector<8x128xf32>
    %24 = arith.mulf %23, %3 : vector<8x128xf32>
    %25 = arith.addf %21, %24 : vector<8x128xf32>
    %cst_6 = arith.constant 0.000000e+00 : f32
    %26 = vector.broadcast %cst_6 : f32 to vector<8x128xf32>
    %27 = arith.maximumf %25, %26 : vector<8x128xf32>
    %c10 = arith.constant 10 : index
    %28 = memref.load %arg1[%c10] : memref<42xf32, #tpu.memory_space<smem>>
    %c4 = arith.constant 4 : index
    %29 = memref.load %arg1[%c4] : memref<42xf32, #tpu.memory_space<smem>>
    %30 = vector.broadcast %29 : f32 to vector<8x128xf32>
    %31 = arith.mulf %30, %1 : vector<8x128xf32>
    %32 = vector.broadcast %28 : f32 to vector<8x128xf32>
    %33 = arith.addf %32, %31 : vector<8x128xf32>
    %c5 = arith.constant 5 : index
    %34 = memref.load %arg1[%c5] : memref<42xf32, #tpu.memory_space<smem>>
    %35 = vector.broadcast %34 : f32 to vector<8x128xf32>
    %36 = arith.mulf %35, %3 : vector<8x128xf32>
    %37 = arith.addf %33, %36 : vector<8x128xf32>
    %cst_7 = arith.constant 0.000000e+00 : f32
    %38 = vector.broadcast %cst_7 : f32 to vector<8x128xf32>
    %39 = arith.maximumf %37, %38 : vector<8x128xf32>
    %c11 = arith.constant 11 : index
    %40 = memref.load %arg1[%c11] : memref<42xf32, #tpu.memory_space<smem>>
    %c6 = arith.constant 6 : index
    %41 = memref.load %arg1[%c6] : memref<42xf32, #tpu.memory_space<smem>>
    %42 = vector.broadcast %41 : f32 to vector<8x128xf32>
    %43 = arith.mulf %42, %1 : vector<8x128xf32>
    %44 = vector.broadcast %40 : f32 to vector<8x128xf32>
    %45 = arith.addf %44, %43 : vector<8x128xf32>
    %c7 = arith.constant 7 : index
    %46 = memref.load %arg1[%c7] : memref<42xf32, #tpu.memory_space<smem>>
    %47 = vector.broadcast %46 : f32 to vector<8x128xf32>
    %48 = arith.mulf %47, %3 : vector<8x128xf32>
    %49 = arith.addf %45, %48 : vector<8x128xf32>
    %cst_8 = arith.constant 0.000000e+00 : f32
    %50 = vector.broadcast %cst_8 : f32 to vector<8x128xf32>
    %51 = arith.maximumf %49, %50 : vector<8x128xf32>
    %c28 = arith.constant 28 : index
    %52 = memref.load %arg1[%c28] : memref<42xf32, #tpu.memory_space<smem>>
    %c12 = arith.constant 12 : index
    %53 = memref.load %arg1[%c12] : memref<42xf32, #tpu.memory_space<smem>>
    %54 = vector.broadcast %53 : f32 to vector<8x128xf32>
    %55 = arith.mulf %54, %15 : vector<8x128xf32>
    %56 = vector.broadcast %52 : f32 to vector<8x128xf32>
    %57 = arith.addf %56, %55 : vector<8x128xf32>
    %c13 = arith.constant 13 : index
    %58 = memref.load %arg1[%c13] : memref<42xf32, #tpu.memory_space<smem>>
    %59 = vector.broadcast %58 : f32 to vector<8x128xf32>
    %60 = arith.mulf %59, %27 : vector<8x128xf32>
    %61 = arith.addf %57, %60 : vector<8x128xf32>
    %c14 = arith.constant 14 : index
    %62 = memref.load %arg1[%c14] : memref<42xf32, #tpu.memory_space<smem>>
    %63 = vector.broadcast %62 : f32 to vector<8x128xf32>
    %64 = arith.mulf %63, %39 : vector<8x128xf32>
    %65 = arith.addf %61, %64 : vector<8x128xf32>
    %c15 = arith.constant 15 : index
    %66 = memref.load %arg1[%c15] : memref<42xf32, #tpu.memory_space<smem>>
    %67 = vector.broadcast %66 : f32 to vector<8x128xf32>
    %68 = arith.mulf %67, %51 : vector<8x128xf32>
    %69 = arith.addf %65, %68 : vector<8x128xf32>
    %cst_9 = arith.constant 0.000000e+00 : f32
    %70 = vector.broadcast %cst_9 : f32 to vector<8x128xf32>
    %71 = arith.maximumf %69, %70 : vector<8x128xf32>
    %c29 = arith.constant 29 : index
    %72 = memref.load %arg1[%c29] : memref<42xf32, #tpu.memory_space<smem>>
    %c16 = arith.constant 16 : index
    %73 = memref.load %arg1[%c16] : memref<42xf32, #tpu.memory_space<smem>>
    %74 = vector.broadcast %73 : f32 to vector<8x128xf32>
    %75 = arith.mulf %74, %15 : vector<8x128xf32>
    %76 = vector.broadcast %72 : f32 to vector<8x128xf32>
    %77 = arith.addf %76, %75 : vector<8x128xf32>
    %c17 = arith.constant 17 : index
    %78 = memref.load %arg1[%c17] : memref<42xf32, #tpu.memory_space<smem>>
    %79 = vector.broadcast %78 : f32 to vector<8x128xf32>
    %80 = arith.mulf %79, %27 : vector<8x128xf32>
    %81 = arith.addf %77, %80 : vector<8x128xf32>
    %c18 = arith.constant 18 : index
    %82 = memref.load %arg1[%c18] : memref<42xf32, #tpu.memory_space<smem>>
    %83 = vector.broadcast %82 : f32 to vector<8x128xf32>
    %84 = arith.mulf %83, %39 : vector<8x128xf32>
    %85 = arith.addf %81, %84 : vector<8x128xf32>
    %c19 = arith.constant 19 : index
    %86 = memref.load %arg1[%c19] : memref<42xf32, #tpu.memory_space<smem>>
    %87 = vector.broadcast %86 : f32 to vector<8x128xf32>
    %88 = arith.mulf %87, %51 : vector<8x128xf32>
    %89 = arith.addf %85, %88 : vector<8x128xf32>
    %cst_10 = arith.constant 0.000000e+00 : f32
    %90 = vector.broadcast %cst_10 : f32 to vector<8x128xf32>
    %91 = arith.maximumf %89, %90 : vector<8x128xf32>
    %c30 = arith.constant 30 : index
    %92 = memref.load %arg1[%c30] : memref<42xf32, #tpu.memory_space<smem>>
    %c20 = arith.constant 20 : index
    %93 = memref.load %arg1[%c20] : memref<42xf32, #tpu.memory_space<smem>>
    %94 = vector.broadcast %93 : f32 to vector<8x128xf32>
    %95 = arith.mulf %94, %15 : vector<8x128xf32>
    %96 = vector.broadcast %92 : f32 to vector<8x128xf32>
    %97 = arith.addf %96, %95 : vector<8x128xf32>
    %c21 = arith.constant 21 : index
    %98 = memref.load %arg1[%c21] : memref<42xf32, #tpu.memory_space<smem>>
    %99 = vector.broadcast %98 : f32 to vector<8x128xf32>
    %100 = arith.mulf %99, %27 : vector<8x128xf32>
    %101 = arith.addf %97, %100 : vector<8x128xf32>
    %c22 = arith.constant 22 : index
    %102 = memref.load %arg1[%c22] : memref<42xf32, #tpu.memory_space<smem>>
    %103 = vector.broadcast %102 : f32 to vector<8x128xf32>
    %104 = arith.mulf %103, %39 : vector<8x128xf32>
    %105 = arith.addf %101, %104 : vector<8x128xf32>
    %c23 = arith.constant 23 : index
    %106 = memref.load %arg1[%c23] : memref<42xf32, #tpu.memory_space<smem>>
    %107 = vector.broadcast %106 : f32 to vector<8x128xf32>
    %108 = arith.mulf %107, %51 : vector<8x128xf32>
    %109 = arith.addf %105, %108 : vector<8x128xf32>
    %cst_11 = arith.constant 0.000000e+00 : f32
    %110 = vector.broadcast %cst_11 : f32 to vector<8x128xf32>
    %111 = arith.maximumf %109, %110 : vector<8x128xf32>
    %c31 = arith.constant 31 : index
    %112 = memref.load %arg1[%c31] : memref<42xf32, #tpu.memory_space<smem>>
    %c24 = arith.constant 24 : index
    %113 = memref.load %arg1[%c24] : memref<42xf32, #tpu.memory_space<smem>>
    %114 = vector.broadcast %113 : f32 to vector<8x128xf32>
    %115 = arith.mulf %114, %15 : vector<8x128xf32>
    %116 = vector.broadcast %112 : f32 to vector<8x128xf32>
    %117 = arith.addf %116, %115 : vector<8x128xf32>
    %c25 = arith.constant 25 : index
    %118 = memref.load %arg1[%c25] : memref<42xf32, #tpu.memory_space<smem>>
    %119 = vector.broadcast %118 : f32 to vector<8x128xf32>
    %120 = arith.mulf %119, %27 : vector<8x128xf32>
    %121 = arith.addf %117, %120 : vector<8x128xf32>
    %c26 = arith.constant 26 : index
    %122 = memref.load %arg1[%c26] : memref<42xf32, #tpu.memory_space<smem>>
    %123 = vector.broadcast %122 : f32 to vector<8x128xf32>
    %124 = arith.mulf %123, %39 : vector<8x128xf32>
    %125 = arith.addf %121, %124 : vector<8x128xf32>
    %c27 = arith.constant 27 : index
    %126 = memref.load %arg1[%c27] : memref<42xf32, #tpu.memory_space<smem>>
    %127 = vector.broadcast %126 : f32 to vector<8x128xf32>
    %128 = arith.mulf %127, %51 : vector<8x128xf32>
    %129 = arith.addf %125, %128 : vector<8x128xf32>
    %cst_12 = arith.constant 0.000000e+00 : f32
    %130 = vector.broadcast %cst_12 : f32 to vector<8x128xf32>
    %131 = arith.maximumf %129, %130 : vector<8x128xf32>
    %c40 = arith.constant 40 : index
    %132 = memref.load %arg1[%c40] : memref<42xf32, #tpu.memory_space<smem>>
    %c32 = arith.constant 32 : index
    %133 = memref.load %arg1[%c32] : memref<42xf32, #tpu.memory_space<smem>>
    %134 = vector.broadcast %133 : f32 to vector<8x128xf32>
    %135 = arith.mulf %134, %71 : vector<8x128xf32>
    %136 = vector.broadcast %132 : f32 to vector<8x128xf32>
    %137 = arith.addf %136, %135 : vector<8x128xf32>
    %c33 = arith.constant 33 : index
    %138 = memref.load %arg1[%c33] : memref<42xf32, #tpu.memory_space<smem>>
    %139 = vector.broadcast %138 : f32 to vector<8x128xf32>
    %140 = arith.mulf %139, %91 : vector<8x128xf32>
    %141 = arith.addf %137, %140 : vector<8x128xf32>
    %c34 = arith.constant 34 : index
    %142 = memref.load %arg1[%c34] : memref<42xf32, #tpu.memory_space<smem>>
    %143 = vector.broadcast %142 : f32 to vector<8x128xf32>
    %144 = arith.mulf %143, %111 : vector<8x128xf32>
    %145 = arith.addf %141, %144 : vector<8x128xf32>
    %c35 = arith.constant 35 : index
    %146 = memref.load %arg1[%c35] : memref<42xf32, #tpu.memory_space<smem>>
    %147 = vector.broadcast %146 : f32 to vector<8x128xf32>
    %148 = arith.mulf %147, %131 : vector<8x128xf32>
    %149 = arith.addf %145, %148 : vector<8x128xf32>
    %c0_13 = arith.constant 0 : index
    %c0_14 = arith.constant 0 : index
    %c0_15 = arith.constant 0 : index
    %150 = vector.load %arg3[%c0_13, %c0_14, %c0_15] : memref<2x8x128xf32, #tpu.memory_space<vmem>>, vector<1x8x128xf32>
    %151 = vector.shape_cast %150 : vector<1x8x128xf32> to vector<8x128xf32>
    %152 = vector.shape_cast %149 : vector<8x128xf32> to vector<1x8x128xf32>
    tpu.vector_store %arg3[%c0_13, %c0_14, %c0_15], %152 {strides = array<i32>} : memref<2x8x128xf32, #tpu.memory_space<vmem>>, vector<1x8x128xf32>,
    %c41 = arith.constant 41 : index
    %153 = memref.load %arg1[%c41] : memref<42xf32, #tpu.memory_space<smem>>
    %c36 = arith.constant 36 : index
    %154 = memref.load %arg1[%c36] : memref<42xf32, #tpu.memory_space<smem>>
    %155 = vector.broadcast %154 : f32 to vector<8x128xf32>
    %156 = arith.mulf %155, %71 : vector<8x128xf32>
    %157 = vector.broadcast %153 : f32 to vector<8x128xf32>
    %158 = arith.addf %157, %156 : vector<8x128xf32>
    %c37 = arith.constant 37 : index
    %159 = memref.load %arg1[%c37] : memref<42xf32, #tpu.memory_space<smem>>
    %160 = vector.broadcast %159 : f32 to vector<8x128xf32>
    %161 = arith.mulf %160, %91 : vector<8x128xf32>
    %162 = arith.addf %158, %161 : vector<8x128xf32>
    %c38 = arith.constant 38 : index
    %163 = memref.load %arg1[%c38] : memref<42xf32, #tpu.memory_space<smem>>
    %164 = vector.broadcast %163 : f32 to vector<8x128xf32>
    %165 = arith.mulf %164, %111 : vector<8x128xf32>
    %166 = arith.addf %162, %165 : vector<8x128xf32>
    %c39 = arith.constant 39 : index
    %167 = memref.load %arg1[%c39] : memref<42xf32, #tpu.memory_space<smem>>
    %168 = vector.broadcast %167 : f32 to vector<8x128xf32>
    %169 = arith.mulf %168, %131 : vector<8x128xf32>
    %170 = arith.addf %166, %169 : vector<8x128xf32>
    %c1_16 = arith.constant 1 : index
    %c0_17 = arith.constant 0 : index
    %c0_18 = arith.constant 0 : index
    %171 = vector.load %arg3[%c1_16, %c0_17, %c0_18] : memref<2x8x128xf32, #tpu.memory_space<vmem>>, vector<1x8x128xf32>
    %172 = vector.shape_cast %171 : vector<1x8x128xf32> to vector<8x128xf32>
    %173 = vector.shape_cast %170 : vector<8x128xf32> to vector<1x8x128xf32>
    tpu.vector_store %arg3[%c1_16, %c0_17, %c0_18], %173 {strides = array<i32>} : memref<2x8x128xf32, #tpu.memory_space<vmem>>, vector<1x8x128xf32>,
    return
  }
  func.func @transform_0(%arg0: i32) -> i32 {
    %c0_i32 = arith.constant 0 : i32
    %c0_i32_0 = arith.constant 0 : i32
    return %c0_i32 : i32
  }
  func.func @transform_1(%arg0: i32) -> (i32, i32, i32) {
    %c0_i32 = arith.constant 0 : i32
    %c0_i32_0 = arith.constant 0 : i32
    %c0_i32_1 = arith.constant 0 : i32
    return %c0_i32, %arg0, %c0_i32_0 : i32, i32, i32
  }
  func.func @transform_2(%arg0: i32) -> (i32, i32, i32) {
    %c0_i32 = arith.constant 0 : i32
    %c0_i32_0 = arith.constant 0 : i32
    %c0_i32_1 = arith.constant 0 : i32
    return %c0_i32, %arg0, %c0_i32_0 : i32, i32, i32
  }
}

</mosaic_0001>

<bundles_post_ra>
// kernel: tpu_custom_call.1
= control target key start
LH: loop header
LB: loop body
LE: loop exit
PB: predicated region body
PF: predicated region fallthrough
CT: control target
= control target key end

     0   :  { %7 = vsyncpa [#allocation5], 0  ;;  %s412_s0 = inlined_call_operand.hbm [shape: f32[42], index: 0, kind: input, shape index: {}]   ;;  %s413_s1 = inlined_call_operand.hbm [shape: f32[2,8,128], index: 1, kind: input, shape index: {}]   ;;  %s414_s2 = inlined_call_operand.hbm [shape: f32[2,8,128], index: 2, kind: output, shape index: {}]  }
   0x1   :  { %8 = vsyncpa [#allocation3], 0 }
   0x2   :  { %9 = vsyncpa [#allocation4], 0  ;;  %s15_s11 = sshll.u32 %s412_s0, 4  ;;  %s23_s14 = sshll.u32 %s413_s1, 4  ;;  %s16_s11 = int_to_ptr.hbm [resolvable:$true] %s15_s11  ;;  %s24_s14 = int_to_ptr.hbm [resolvable:$true] %s23_s14 }
   0x3   :  { %s335_s15 = smov [#allocation2]   ;;  %s336_s16 = smov [#allocation6]  }
   0x4   :  { %18 = dma.hbm_to_smem %s16_s11, 16, %s335_s15, [#allocation5]  }
   0x5   :  { %s25_s17 = sshll.u32 %s336_s16, 4  ;;  %s337_s18 = smov 128   ;;  %s26_s17 = int_to_ptr.vmem [resolvable:$true] %s25_s17 }
   0x6   :  { %s338_s19 = smov 8  }
   0x7   :  { %31 = dma.hbm_to_vmem [thread:$0]  %s24_s14, 256, %s26_s17, [#allocation3], %s337_s18, %s337_s18, %s338_s19  }
   0x8   :  { %329 = dma.done.wait [#allocation5], 16  }
   0x9   :  { %330 = vsyncadd [#allocation5], 4294967280 }
   0xa   :  { %331 = dma.done.wait [#allocation3], 256  }
   0xb   :  { %332 = vsyncadd [#allocation3], 4294967040 }
   0xc   :  { %40 = sfence }
   0xd   :  { %s223_s0 = sld [smem:[#allocation2 + $0x8]]  ;;  %v41_v0 = vld [vmem:[#allocation6] sm:$0xff]  ;;  %v43_v1 = vld [vmem:[#allocation6 + $0x8] sm:$0xff] }
   0xe   :  { %s45_s20 = sld [smem:[#allocation2]] }
   0xf   :  { %s224_s1 = sld [smem:[#allocation2 + $0x1]] }
  0x10   :  { %s225_s21 = sld [smem:[#allocation2 + $0x9]] }
  0x11   :  { %s226_s22 = sld [smem:[#allocation2 + $0x2]] }
  0x12   :  { %s227_s23 = sld [smem:[#allocation2 + $0x3]] }
  0x13   :  { %s228_s24 = sld [smem:[#allocation2 + $0xa]]  ;;  %v48_v3 = vstv %s223_s0 }
  0x14   :  { %v46_v2 = vstv %s45_s20  ;;  %s229_s25 = sld [smem:[#allocation2 + $0x4]] }
  0x15   :  { %v47_v4 = vmul.f32 %v46_v2, %v41_v0  ;;  %v51_v5 = vstv %s224_s1  ;;  %s230_s26 = sld [smem:[#allocation2 + $0x5]] }
  0x16   :  { %v52_v6 = vmul.f32 %v51_v5, %v43_v1  ;;  %s364_s27 = sld [smem:[#allocation2 + $0xb]]  ;;  %v59_v9 = vstv %s225_s21 }
  0x17   :  { %v49_v7 = vadd.f32 %v48_v3, %v47_v4  ;;  %v57_v8 = vstv %s226_s22  ;;  %s232_s28 = sld [smem:[#allocation2 + $0x6]] }
  0x18   :  { %v58_v10 = vmul.f32 %v57_v8, %v41_v0  ;;  %v62_v11 = vstv %s227_s23  ;;  %s233_s29 = sld [smem:[#allocation2 + $0x7]] }
  0x19   :  { %v53_v12 = vadd.f32 %v52_v6, %v49_v7  ;;  %v63_v13 = vmul.f32 %v62_v11, %v43_v1  ;;  %s366_s30 = sld [smem:[#allocation2 + $0x1c]]  ;;  %v70_v16 = vstv %s228_s24 }
  0x1a   :  { %v60_v14 = vadd.f32 %v59_v9, %v58_v10  ;;  %v68_v15 = vstv %s229_s25  ;;  %s235_s3 = sld [smem:[#allocation2 + $0xc]] }
  0x1b   :  { %v69_v17 = vmul.f32 %v68_v15, %v41_v0  ;;  %v73_v18 = vstv %s230_s26  ;;  %s236_s4 = sld [smem:[#allocation2 + $0xd]]  ;;  %v368_v21 = vmax.f32 %v53_v12, 0.0 }
  0x1c   :  { %v64_v19 = vadd.f32 %v63_v13, %v60_v14  ;;  %v74_v20 = vmul.f32 %v73_v18, %v43_v1  ;;  %s237_s5 = sld [smem:[#allocation2 + $0xe]]  ;;  %v81_v24 = vstv %s364_s27 }
  0x1d   :  { %v71_v22 = vadd.f32 %v70_v16, %v69_v17  ;;  %v79_v23 = vstv %s232_s28  ;;  %s371_s6 = sld [smem:[#allocation2 + $0xf]] }
  0x1e   :  { %v373_v25 = vmax.f32 %v64_v19, 0.0  ;;  %v80_v26 = vmul.f32 %v79_v23, %v41_v0  ;;  %v84_v27 = vstv %s233_s29  ;;  %s375_s7 = sld [smem:[#allocation2 + $0x1d]] }
  0x1f   :  { %v75_v28 = vadd.f32 %v74_v20, %v71_v22  ;;  %v85_v29 = vmul.f32 %v84_v27, %v43_v1  ;;  %s240_s8 = sld [smem:[#allocation2 + $0x10]]  ;;  %v92_v32 = vstv %s366_s30 }
  0x20   :  { %v82_v30 = vadd.f32 %v81_v24, %v80_v26  ;;  %v90_v31 = vstv %s235_s3  ;;  %s241_s9 = sld [smem:[#allocation2 + $0x11]] }
  0x21   :  { %v378_v33 = vmax.f32 %v75_v28, 0.0  ;;  %v91_v34 = vmul.f32 %v90_v31, %v368_v21  ;;  %v95_v35 = vstv %s236_s4  ;;  %s242_s10 = sld [smem:[#allocation2 + $0x12]]  ;;  %s339_s4 = smov [#allocation7]  }
  0x22   :  { %v86_v36 = vadd.f32 %v85_v29, %v82_v30  ;;  %v96_v37 = vmul.f32 %v95_v35, %v373_v25  ;;  %v99_v38 = vstv %s237_s5  ;;  %s243_s11 = sld [smem:[#allocation2 + $0x13]]  ;;  %s207_s5 = sshll.u32 %s339_s4, 4  ;;  %s208_s5 = int_to_ptr.vmem [resolvable:$true] %s207_s5 }
  0x23   :  { %v93_v39 = vadd.f32 %v92_v32, %v91_v34  ;;  %s382_s12 = sld [smem:[#allocation2 + $0x1e]]  ;;  %v100_v40 = vmul.f32 %v99_v38, %v378_v33  ;;  %v103_v45 = vstv %s371_s6 }
  0x24   :  { %s245_s13 = sld [smem:[#allocation2 + $0x14]]  ;;  %v87_v41 = vmax.f32 %v86_v36, 0.0  ;;  %v111_v44 = vstv %s375_s7 }
  0x25   :  { %v97_v42 = vadd.f32 %v96_v37, %v93_v39  ;;  %v109_v43 = vstv %s240_s8  ;;  %s246_s14 = sld [smem:[#allocation2 + $0x15]]  ;;  %s209_s8 = sshll.u32 %s414_s2, 4  ;;  %s210_s8 = int_to_ptr.hbm [resolvable:$true] %s209_s8 }
  0x26   :  { %v110_v46 = vmul.f32 %v109_v43, %v368_v21  ;;  %v114_v47 = vstv %s241_s9  ;;  %s247_s15 = sld [smem:[#allocation2 + $0x16]]  ;;  %v104_v54 = vmul.f32 %v103_v45, %v87_v41 }
  0x27   :  { %v115_v48 = vmul.f32 %v114_v47, %v373_v25  ;;  %v118_v49 = vstv %s242_s10  ;;  %s248_s16 = sld [smem:[#allocation2 + $0x17]]  ;;  %v101_v53 = vadd.f32 %v100_v40, %v97_v42 }
  0x28   :  { %v112_v50 = vadd.f32 %v111_v44, %v110_v46  ;;  %v119_v51 = vmul.f32 %v118_v49, %v378_v33  ;;  %v122_v52 = vstv %s243_s11  ;;  %s390_s17 = sld [smem:[#allocation2 + $0x1f]] }
  0x29   :  { %s250_s0 = sld [smem:[#allocation2 + $0x18]]  ;;  %v123_v56 = vmul.f32 %v122_v52, %v87_v41  ;;  %v130_v58 = vstv %s382_s12  ;;  %v105_v0 = vadd.f32 %v104_v54, %v101_v53 }
  0x2a   :  { %v116_v55 = vadd.f32 %v115_v48, %v112_v50  ;;  %v128_v57 = vstv %s245_s13  ;;  %s251_s20 = sld [smem:[#allocation2 + $0x19]] }
  0x2b   :  { %v129_v59 = vmul.f32 %v128_v57, %v368_v21  ;;  %v133_v60 = vstv %s246_s14  ;;  %s252_s1 = sld [smem:[#allocation2 + $0x1a]]  ;;  %v106_v11 = vmax.f32 %v105_v0, 0.0 }
  0x2c   :  { %v120_v61 = vadd.f32 %v119_v51, %v116_v55  ;;  %v134_v62 = vmul.f32 %v133_v60, %v373_v25  ;;  %v137_v63 = vstv %s247_s15  ;;  %s253_s21 = sld [smem:[#allocation2 + $0x1b]] }
  0x2d   :  { %v131_v1 = vadd.f32 %v130_v58, %v129_v59  ;;  %v138_v2 = vmul.f32 %v137_v63, %v378_v33  ;;  %v141_v3 = vstv %s248_s16  ;;  %s396_s22 = sld [smem:[#allocation2 + $0x28]] }
  0x2e   :  { %v124_v4 = vadd.f32 %v123_v56, %v120_v61  ;;  %s255_s23 = sld [smem:[#allocation2 + $0x20]]  ;;  %v142_v6 = vmul.f32 %v141_v3, %v87_v41  ;;  %v149_v8 = vstv %s390_s17 }
  0x2f   :  { %v135_v5 = vadd.f32 %v134_v62, %v131_v1  ;;  %v147_v7 = vstv %s250_s0  ;;  %s256_s24 = sld [smem:[#allocation2 + $0x21]] }
  0x30   :  { %v148_v9 = vmul.f32 %v147_v7, %v368_v21  ;;  %v152_v10 = vstv %s251_s20  ;;  %s257_s25 = sld [smem:[#allocation2 + $0x22]]  ;;  %v125_v15 = vmax.f32 %v124_v4, 0.0 }
  0x31   :  { %v139_v12 = vadd.f32 %v138_v2, %v135_v5  ;;  %v153_v13 = vmul.f32 %v152_v10, %v373_v25  ;;  %v156_v14 = vstv %s252_s1  ;;  %s401_s26 = sld [smem:[#allocation2 + $0x23]] }
  0x32   :  { %v150_v16 = vadd.f32 %v149_v8, %v148_v9  ;;  %v157_v17 = vmul.f32 %v156_v14, %v378_v33  ;;  %v160_v18 = vstv %s253_s21  ;;  %s259_s27 = sld [smem:[#allocation2 + $0x29]] }
  0x33   :  { %v143_v19 = vadd.f32 %v142_v6, %v139_v12  ;;  %s260_s28 = sld [smem:[#allocation2 + $0x24]]  ;;  %v161_v21 = vmul.f32 %v160_v18, %v87_v41  ;;  %v168_v23 = vstv %s396_s22 }
  0x34   :  { %v154_v20 = vadd.f32 %v153_v13, %v150_v16  ;;  %v166_v22 = vstv %s255_s23  ;;  %s261_s29 = sld [smem:[#allocation2 + $0x25]] }
  0x35   :  { %v144_v24 = vmax.f32 %v143_v19, 0.0  ;;  %v167_v26 = vmul.f32 %v166_v22, %v106_v11  ;;  %v171_v25 = vstv %s256_s24  ;;  %s262_s30 = sld [smem:[#allocation2 + $0x26]] }
  0x36   :  { %v158_v27 = vadd.f32 %v157_v17, %v154_v20  ;;  %v172_v28 = vmul.f32 %v171_v25, %v125_v15  ;;  %v175_v29 = vstv %s257_s25  ;;  %s263_s3 = sld [smem:[#allocation2 + $0x27]] }
  0x37   :  { %v169_v30 = vadd.f32 %v168_v23, %v167_v26  ;;  %v176_v31 = vmul.f32 %v175_v29, %v144_v24  ;;  %v179_v34 = vstv %s401_s26 }
  0x38   :  { %v162_v32 = vadd.f32 %v161_v21, %v158_v27  ;;  %v187_v36 = vstv %s259_s27 }
  0x39   :  { %v173_v33 = vadd.f32 %v172_v28, %v169_v30  ;;  %v185_v35 = vstv %s260_s28 }
  0x3a   :  { %v163_v37 = vmax.f32 %v162_v32, 0.0  ;;  %v186_v38 = vmul.f32 %v185_v35, %v106_v11  ;;  %v190_v39 = vstv %s261_s29 }
  0x3b   :  { %v177_v40 = vadd.f32 %v176_v31, %v173_v33  ;;  %v191_v41 = vmul.f32 %v190_v39, %v125_v15  ;;  %v194_v42 = vstv %s262_s30 }
  0x3c   :  { %v180_v43 = vmul.f32 %v179_v34, %v163_v37  ;;  %v188_v44 = vadd.f32 %v187_v36, %v186_v38  ;;  %v195_v45 = vmul.f32 %v194_v42, %v144_v24  ;;  %v198_v46 = vstv %s263_s3 }
  0x3d   :  { %v199_v49 = vmul.f32 %v198_v46, %v163_v37 }
  0x3e   :  { %v181_v47 = vadd.f32 %v180_v43, %v177_v40  ;;  %v192_v48 = vadd.f32 %v191_v41, %v188_v44 }
  0x40   :  { %182 = vst [vmem:[#allocation7] sm:$0xff] %v181_v47  ;;  %v196_v50 = vadd.f32 %v195_v45, %v192_v48 }
  0x42   :  { %v200_v51 = vadd.f32 %v199_v49, %v196_v50 }
  0x44   :  { %202 = vst [vmem:[#allocation7 + $0x8] sm:$0xff] %v200_v51 }
  0x45   :  { %215 = dma.vmem_to_hbm [thread:$0]  %s208_s5, 256, %s210_s8, [#allocation4], %s337_s18, %s337_s18, %s338_s19  }
  0x46   :  { %333 = dma.done.wait [#allocation4], 256  }
  0x47   :  { %334 = vsyncadd [#allocation4], 4294967040 }
  0x48   :  { %220 = vsyncpa [#allocation3], 1 }
  0x49   :  { %221 = vsyncpa [#allocation4], 1 }
  0x4a   :  { %222 = vsyncpa [#allocation5], 1 }

</bundles_post_ra>
